<compile_context>
chip_gen: v7x
topology: tpu7x:2x2x1
jax: 0.10.0
libtpu: 0.0.40
codegen_flags: <defaults>
</compile_context>

<pallas_src>
import functools

import jax
import jax.numpy as jnp
from jax.experimental import pallas as pl
from jax.experimental.pallas import tpu as pltpu


def _round_up(x, m):
    return ((x + m - 1) // m) * m


def _round_down(x, m):
    return (x // m) * m


def _cdiv(a, b):
    return (a + b - 1) // b


# Double-buffered logits-tile budget and scoped-VMEM limit, chosen so the
# kernel fits comfortably on every generation (v7x: 64 MiB physical per TC).
_LOGITS_VMEM_BUDGET = 24 << 20
_VMEM_LIMIT_BYTES = 48 << 20


def mmc_ch_kernel(logits_ref, labels_ref, out_ref, *, scale, batch, tb, tiles_per_core):
    """Accumulate sum_i logits[i, label[i]] over this core's batch tiles into out_ref."""
    c = pl.program_id(0)   # partial / core index ("parallel")
    i = pl.program_id(1)   # batch-tile step within this core ("arbitrary")

    # out_ref is VMEM-resident across the i axis (constant index_map for fixed c),
    # so it doubles as the accumulator: zero it on each core's first step.
    @pl.when(i == 0)
    def _():
        out_ref[...] = jnp.zeros_like(out_ref)

    TB, L = logits_ref.shape
    # Logical (unclamped) tile index: the index_map clamps the DMA source so it
    # never reads out of range; correctness comes from masking on the logical rows.
    t = c * tiles_per_core + i
    row_ids = t * tb + jax.lax.broadcasted_iota(jnp.int32, (TB, L), 0)
    class_ids = jax.lax.broadcasted_iota(jnp.int32, (TB, L), 1)
    labels = labels_ref[...]                                   # (TB, 1) int32

    # One-hot gather fused with the row-validity mask. jnp.where (select) keeps
    # any garbage from partial/overshoot tiles out of the sum (even NaNs).
    valid = (row_ids < batch) & (labels == class_ids)
    picked = jnp.where(valid, logits_ref[...].astype(jnp.float32), 0.0)
    out_ref[...] += jnp.sum(picked, keepdims=True)             # (1, 1)

    # Apply -1/B exactly once per core, on its final step.
    @pl.when(i == tiles_per_core - 1)
    def _():
        out_ref[...] = out_ref[...] * scale


def mmc_loss_ch(logits, label, *, tb_max=1024, num_partials=2):
    """logits: (B, L) float, label: (B,) int -> scalar f32 = -mean(logits[i, label[i]])."""
    B, L = logits.shape
    itemsize = jnp.dtype(logits.dtype).itemsize
    # Sublane multiple for the native dtype (f32: 8, bf16: 16, int8/fp8: 32).
    sub = {4: 8, 2: 16, 1: 32}.get(itemsize, 8)

    # Derive TB from L and the VMEM budget. A (TB, L) block occupies
    # round_up(L, 128) lanes in VMEM regardless of L, and is double-buffered.
    per_row_bytes = _round_up(L, 128) * itemsize
    tb = _LOGITS_VMEM_BUDGET // (2 * per_row_bytes)
    tb = max(sub, min(tb, int(tb_max)))
    tb = max(sub, _round_down(tb, sub))
    if tb >= B:
        tb = B                          # single full-batch tile (full dim is always legal)

    n_tiles = _cdiv(B, tb)
    # Leading "parallel" axis: up to 2 partials so v7x can shard across its 2 TCs.
    C = max(1, min(int(num_partials), n_tiles))
    tpc = _cdiv(n_tiles, C)             # tiles per core

    labels_2d = label.astype(jnp.int32).reshape(B, 1)
    scale = -1.0 / float(B)             # negate + mean over the real batch size

    def tile_map(c, i):
        # Clamp overshoot steps onto the last real tile (their rows are masked
        # in-kernel), so the DMA source block index is always in range.
        return (jnp.minimum(c * tpc + i, n_tiles - 1), 0)

    partials = pl.pallas_call(
        functools.partial(mmc_ch_kernel, scale=scale, batch=B, tb=tb, tiles_per_core=tpc),
        out_shape=jax.ShapeDtypeStruct((C, 1), jnp.float32),
        grid_spec=pltpu.PrefetchScalarGridSpec(
            num_scalar_prefetch=0,
            grid=(C, tpc),
            in_specs=[
                pl.BlockSpec((tb, L), tile_map),   # logits streamed in native dtype
                pl.BlockSpec((tb, 1), tile_map),   # labels streamed alongside
            ],
            # Per-core output row; constant over i -> VMEM-resident accumulator.
            out_specs=pl.BlockSpec((1, 1), lambda c, i: (c, 0)),
        ),
        compiler_params=pltpu.CompilerParams(
            dimension_semantics=("parallel", "arbitrary"),
            vmem_limit_bytes=_VMEM_LIMIT_BYTES,
        ),
    )(logits, labels_2d)

    # Each partial is already scaled by -1/B; summing them gives -mean.
    return jnp.sum(partials)


if __name__ == "__main__":
    key = jax.random.PRNGKey(0)
    k1, k2, k3, k4, k5, k6 = jax.random.split(key, 6)

    # 1) Small single-tile case matching the module's typical (batch, class) logits.
    batch, class_num = 8, 10
    logits = jax.random.normal(k1, (batch, class_num), dtype=jnp.float32)
    labels = jax.random.randint(k2, (batch,), 0, class_num, dtype=jnp.int32)
    loss = jax.block_until_ready(mmc_loss_ch(logits, labels))
    ref = -jnp.mean(logits[jnp.arange(batch), labels])
    assert jnp.allclose(loss, ref, rtol=1e-5, atol=1e-6), (loss, ref)

    # 2) Multi-tile grid with a partial last tile AND a clamped overshoot step:
    #    exercises the in-kernel row-validity mask and the two-partial reduction.
    batch2 = 40
    logits2 = jax.random.normal(k3, (batch2, class_num), dtype=jnp.float32)
    labels2 = jax.random.randint(k4, (batch2,), 0, class_num, dtype=jnp.int32)
    loss2 = jax.block_until_ready(mmc_loss_ch(logits2, labels2, tb_max=16))
    ref2 = -jnp.mean(logits2[jnp.arange(batch2), labels2])
    assert jnp.allclose(loss2, ref2, rtol=1e-5, atol=1e-6), (loss2, ref2)

    # 3) Native bf16 streaming (no wrapper upcast); cast to f32 happens in-kernel.
    batch3, class_num3 = 48, 24
    logits3 = jax.random.normal(k5, (batch3, class_num3), dtype=jnp.bfloat16)
    labels3 = jax.random.randint(k6, (batch3,), 0, class_num3, dtype=jnp.int32)
    loss3 = jax.block_until_ready(mmc_loss_ch(logits3, labels3, tb_max=32))
    ref3 = -jnp.mean(logits3[jnp.arange(batch3), labels3].astype(jnp.float32))
    assert jnp.allclose(loss3, ref3, rtol=1e-5, atol=1e-5), (loss3, ref3)

    print("KERNEL_OK")
</pallas_src>

<mosaic_0001>
module attributes {stable_mosaic.version = 11 : i64} {
  func.func @mmc_ch_kernel(%arg0: i32, %arg1: i32, %arg2: memref<8x10xf32, #tpu.memory_space<vmem>>, %arg3: memref<8x1xi32, #tpu.memory_space<vmem>>, %arg4: memref<1x1xf32, #tpu.memory_space<vmem>>) attributes {dimension_semantics = [#tpu.dimension_semantics<parallel>, #tpu.dimension_semantics<arbitrary>], iteration_bounds = array<i64: 1, 1>, scalar_prefetch = 0 : i64, scratch_operands = 0 : i64, tpu.core_type = #tpu.core_type<tc>, window_params = [{transform_indices = @transform_0, window_bounds = array<i64: 8, 10>}, {transform_indices = @transform_1, window_bounds = array<i64: 8, 1>}, {transform_indices = @transform_2, window_bounds = array<i64: 1, 1>}]} {
    %c0_i32 = arith.constant 0 : i32
    %0 = arith.cmpi eq, %arg1, %c0_i32 : i32
    %1 = arith.extui %0 : i1 to i32
    %c0_i32_0 = arith.constant 0 : i32
    %2 = arith.cmpi ne, %1, %c0_i32_0 : i32
    scf.if %2 {
      %cst_12 = arith.constant 0.000000e+00 : f32
      %30 = vector.broadcast %cst_12 : f32 to vector<1x1xf32>
      %c0_13 = arith.constant 0 : index
      %c0_14 = arith.constant 0 : index
      %31 = vector.load %arg4[%c0_13, %c0_14] : memref<1x1xf32, #tpu.memory_space<vmem>>, vector<1x1xf32>
      tpu.vector_store %arg4[%c0_13, %c0_14], %30 {strides = array<i32>} : memref<1x1xf32, #tpu.memory_space<vmem>>, vector<1x1xf32>,
    } else {
    }
    %c1_i32 = arith.constant 1 : i32
    %3 = arith.muli %arg0, %c1_i32 : i32
    %4 = arith.addi %3, %arg1 : i32
    %c8_i32 = arith.constant 8 : i32
    %5 = arith.muli %4, %c8_i32 : i32
    %6 = tpu.iota {dimensions = array<i32: 0>} : vector<8x10xi32>
    %7 = vector.broadcast %5 : i32 to vector<8x10xi32>
    %8 = arith.addi %7, %6 : vector<8x10xi32>
    %9 = tpu.iota {dimensions = array<i32: 1>} : vector<8x10xi32>
    %c0 = arith.constant 0 : index
    %c0_1 = arith.constant 0 : index
    %10 = vector.load %arg3[%c0, %c0_1] : memref<8x1xi32, #tpu.memory_space<vmem>>, vector<8x1xi32>
    %c8_i32_2 = arith.constant 8 : i32
    %11 = vector.broadcast %c8_i32_2 : i32 to vector<8x10xi32>
    %12 = arith.cmpi slt, %8, %11 : vector<8x10xi32>
    %13 = vector.broadcast %10 : vector<8x1xi32> to vector<8x10xi32>
    %14 = arith.cmpi eq, %13, %9 : vector<8x10xi32>
    %15 = arith.andi %12, %14 : vector<8x10xi1>
    %c0_3 = arith.constant 0 : index
    %c0_4 = arith.constant 0 : index
    %16 = vector.load %arg2[%c0_3, %c0_4] : memref<8x10xf32, #tpu.memory_space<vmem>>, vector<8x10xf32>
    %cst = arith.constant 0.000000e+00 : f32
    %17 = vector.broadcast %cst : f32 to vector<8x10xf32>
    %18 = arith.select %15, %16, %17 : vector<8x10xi1>, vector<8x10xf32>
    %c0_5 = arith.constant 0 : index
    %c0_6 = arith.constant 0 : index
    %19 = vector.load %arg4[%c0_5, %c0_6] : memref<1x1xf32, #tpu.memory_space<vmem>>, vector<1x1xf32>
    %20 = vector.shape_cast %18 : vector<8x10xf32> to vector<1x8x10xf32>
    %cst_7 = arith.constant dense<0.000000e+00> : vector<1xf32>
    %21 = vector.multi_reduction <add>, %20, %cst_7 [1, 2] : vector<1x8x10xf32> to vector<1xf32>
    %22 = vector.shape_cast %21 : vector<1xf32> to vector<1x1x1xf32>
    %23 = vector.extract %22[0, 0, 0] : f32 from vector<1x1x1xf32>
    %24 = vector.broadcast %23 : f32 to vector<1x1xf32>
    %25 = arith.addf %19, %24 : vector<1x1xf32>
    %c0_8 = arith.constant 0 : index
    %c0_9 = arith.constant 0 : index
    %26 = vector.load %arg4[%c0_8, %c0_9] : memref<1x1xf32, #tpu.memory_space<vmem>>, vector<1x1xf32>
    tpu.vector_store %arg4[%c0_8, %c0_9], %25 {strides = array<i32>} : memref<1x1xf32, #tpu.memory_space<vmem>>, vector<1x1xf32>,
    %c0_i32_10 = arith.constant 0 : i32
    %27 = arith.cmpi eq, %arg1, %c0_i32_10 : i32
    %28 = arith.extui %27 : i1 to i32
    %c0_i32_11 = arith.constant 0 : i32
    %29 = arith.cmpi ne, %28, %c0_i32_11 : i32
    scf.if %29 {
      %c0_12 = arith.constant 0 : index
      %c0_13 = arith.constant 0 : index
      %30 = vector.load %arg4[%c0_12, %c0_13] : memref<1x1xf32, #tpu.memory_space<vmem>>, vector<1x1xf32>
      %cst_14 = arith.constant -1.250000e-01 : f32
      %31 = vector.broadcast %cst_14 : f32 to vector<1x1xf32>
      %32 = arith.mulf %30, %31 : vector<1x1xf32>
      %c0_15 = arith.constant 0 : index
      %c0_16 = arith.constant 0 : index
      %33 = vector.load %arg4[%c0_15, %c0_16] : memref<1x1xf32, #tpu.memory_space<vmem>>, vector<1x1xf32>
      tpu.vector_store %arg4[%c0_15, %c0_16], %32 {strides = array<i32>} : memref<1x1xf32, #tpu.memory_space<vmem>>, vector<1x1xf32>,
    } else {
    }
    return
  }
  func.func @transform_0(%arg0: i32, %arg1: i32) -> (i32, i32) {
    %c1_i32 = arith.constant 1 : i32
    %0 = arith.muli %arg0, %c1_i32 : i32
    %1 = arith.addi %0, %arg1 : i32
    %c0_i32 = arith.constant 0 : i32
    %2 = arith.minsi %1, %c0_i32 : i32
    %c0_i32_0 = arith.constant 0 : i32
    %c0_i32_1 = arith.constant 0 : i32
    return %2, %c0_i32_0 : i32, i32
  }
  func.func @transform_1(%arg0: i32, %arg1: i32) -> (i32, i32) {
    %c1_i32 = arith.constant 1 : i32
    %0 = arith.muli %arg0, %c1_i32 : i32
    %1 = arith.addi %0, %arg1 : i32
    %c0_i32 = arith.constant 0 : i32
    %2 = arith.minsi %1, %c0_i32 : i32
    %c0_i32_0 = arith.constant 0 : i32
    %c0_i32_1 = arith.constant 0 : i32
    return %2, %c0_i32_0 : i32, i32
  }
  func.func @transform_2(%arg0: i32, %arg1: i32) -> (i32, i32) {
    %c0_i32 = arith.constant 0 : i32
    %c0_i32_0 = arith.constant 0 : i32
    return %arg0, %c0_i32 : i32, i32
  }
}

</mosaic_0001>

<bundles_post_ra>
// kernel: tpu_custom_call.1
= control target key start
LH: loop header
LB: loop body
LE: loop exit
PB: predicated region body
PF: predicated region fallthrough
CT: control target
= control target key end

     0   :  { %s206_s0 = inlined_call_operand.vmem [shape: f32[8,10], index: 0, kind: input, shape index: {}]   ;;  %s207_s1 = inlined_call_operand.vmem [shape: s32[8,1], index: 1, kind: input, shape index: {}]   ;;  %s208_s2 = inlined_call_operand.hbm [shape: f32[1,1], index: 2, kind: output, shape index: {}]  }
   0x1   :  { %v80_v0 = vld [vmem:[%s207_s1] sm:$0xff] }
   0x2   :  { %7 = vsyncpa [#allocation3], 0  ;;  %v167_v1 = vmov 0   ;;  %v78_v2 = vlaneseq  ;;  %v87_v4 = vld [vmem:[%s206_s0] sm:$0xff]  ;;  %vm90_vm0 = vcmask 80896   ;;  %vm70_vm2 = vcmask 0  }
   0x3   :  { %142 = vset.pattern.permute.xlu0 %v167_v1  ;;  %v168_v8 = vmov 0.0   ;;  %s169_s1 = smov [#allocation2]  }
   0x4   :  { %83 = vperm.xlu0 %142, %v80_v0   ;;  %v79_v3 = vand.u32 127, %v78_v2  ;;  %71 = vst.msk [vmem:[#allocation2] sm:$0x1] %vm70_vm2, %v168_v8  ;;  %s117_s13 = sshll.u32 %s169_s1, 4  ;;  %s118_s13 = int_to_ptr.vmem [resolvable:$true] %s117_s13 }
   0x5   :  { %s143_s14 = scalar_lea.vmem %s118_s13, 16  ;;  %s147_s15 = scalar_lea.vmem %s118_s13, 32 }
   0x6   :  { %p144_p0 = scmp.ne.s32.totalorder %s118_s13, %s143_s14  ;;  %p148_p1 = scmp.lt.s32.totalorder %s118_s13, %s118_s13 }
   0x7   :  { %p149_p2 = scmp.lt.s32.totalorder %s147_s15, %s143_s14 }
   0x9   :  { %p150_p3 = por %p149_p2, %p148_p1 }
   0xb   :  { %v89_v16 = vld [vmem:[#allocation2] sm:$0x1]  ;;  %p151_p4 = pnand %p150_p3, %p144_p0 }
  0x83   :  { %v84_v5 = vpop.permute.xlu0 %83 }
  0x84   :  { %vm85_vm1 = vcmp.eq.s32.totalorder %v84_v5, %v79_v3 }
  0x85   :  { %v88_v6 = vsel %vm85_vm1, %v87_v4, 0.0 }
  0x86   :  { %v91_v7 = vsel %vm90_vm0, %v88_v6, 0.0 }
  0x87   :  { %92 = vadd.xlane.f32.xlu0 %v91_v7 }
 0x114   :  { %v93_v9 = vpop.xlane.xlu0 %92 }
 0x115   :  { %v94_v10 = vrot.slane %v93_v9, 4 }
 0x117   :  { %v95_v11 = vadd.f32 %v94_v10, %v93_v9 }
 0x119   :  { %v96_v12 = vrot.slane %v95_v11, 2 }
 0x11b   :  { %v97_v13 = vadd.f32 %v96_v12, %v95_v11 }
 0x11d   :  { %v98_v14 = vrot.slane %v97_v13, 1 }
 0x11f   :  { %v99_v15 = vadd.f32 %v98_v14, %v97_v13 }
 0x121   :  { %137 = vpush %v99_v15 }
 0x152   :  { %s138_s0 = spop %137 }
 0x153   :  { %v101_v17 = vstv %s138_s0 }
 0x154   :  { %v102_v18 = vadd.f32 %v101_v17, %v89_v16 }
 0x156   :  { %104 = vst.msk [vmem:[#allocation2] sm:$0x1] %vm70_vm2, %v102_v18 }
 0x15d   :  { %v108_v19 = vld [vmem:[#allocation2] sm:$0x1] }
 0x15e   :  { %v109_v20 = vmul.f32 -0.125, %v108_v19 }
 0x160   :  { %110 = vst.msk [vmem:[#allocation2] sm:$0x1] %vm70_vm2, %v109_v20 }
 0x161   :  { %154 = shalt.err (!%p151_p4)
}
 0x162   :  { %s155_s18 = scalar_lea.hbm %s208_s2, 16 }
 0x163   :  { %p156_p5 = scmp.ne.s32.totalorder %s208_s2, %s155_s18  ;;  %p159_p6 = scmp.lt.u32.totalorder %s155_s18, %s208_s2 }
 0x165   :  { %p161_p7 = pnand %p159_p6, %p156_p5 }
 0x167   :  { %164 = shalt.err (!%p161_p7)
}
 0x168   :  { %120 = dma.vmem_to_hbm [thread:$0]  %s118_s13, 16, %s208_s2, [#allocation3]  }
 0x169   :  { %165 = dma.done.wait [#allocation3], 16  }
 0x16a   :  { %166 = vsyncadd [#allocation3], 4294967280 }
 0x16b   :  { %124 = vsyncpa [#allocation3], 1 }

</bundles_post_ra>
